<compile_context>
chip_gen: v7x
topology: tpu7x:2x2x1
jax: 0.10.0
libtpu: 0.0.40
codegen_flags: <defaults>
</compile_context>

<pallas_src>
import math

import jax
import jax.numpy as jnp
from jax import lax
from jax.experimental import pallas as pl
from jax.experimental.pallas import tpu as pltpu

BN_EPS = 1e-5  # torch.nn.BatchNorm1d default eps


def _vmem_limit_bytes():
    """Chip-aware scoped-VMEM cap: 64 MiB on v5e/v6e (128 MiB physical), ~48 MiB on
    v7x (64 MiB physical) so Mosaic scratch / double-buffers keep headroom."""
    try:
        cap = int(pltpu.get_tpu_info().vmem_capacity_bytes)
    except Exception:  # pragma: no cover - conservative fallback
        cap = 128 * 1024 * 1024
    return min(64 * 1024 * 1024, (3 * cap) // 4)


def _make_mlp_mu_kernel(input_dim, embed_dims, out_dim, batch, row_offsets):
    """Fused kernel: len(embed_dims) x (Linear+BN+GELU) blocks + final Linear."""
    n_hidden = len(embed_dims)
    inv_b = 1.0 / float(batch)          # baked at trace time; shape is part of the trace
    inv_sqrt2 = 1.0 / math.sqrt(2.0)
    in_dims = (input_dim,) + tuple(embed_dims)   # in-features of matmul l
    out_dims = tuple(embed_dims) + (out_dim,)    # out-features of matmul l

    def kernel(x_ref, wpack_ref, vec_ref, out_ref):
        def matmul(h, l):
            d_in, d_out = in_dims[l], out_dims[l]
            r0 = row_offsets[l]
            w = wpack_ref[r0:r0 + d_in, :d_out]          # static slice of the weight pack
            lhs = h if h.dtype == w.dtype else h.astype(w.dtype)
            return jnp.dot(lhs, w, preferred_element_type=jnp.float32)

        h = x_ref[...]   # (B, d_in); already weight-dtype (cast once in the wrapper)

        for l, e in enumerate(embed_dims):
            # Linear. Hidden-layer bias omitted on purpose: BatchNorm's mean
            # subtraction cancels a constant per-column bias exactly.
            a = matmul(h, l)                               # (B, e) f32

            gamma = vec_ref[2 * l:2 * l + 1, :e]           # (1, e)
            beta = vec_ref[2 * l + 1:2 * l + 2, :e]        # (1, e)

            # BatchNorm1d training-mode stats: two independent sublane reductions
            # (no lane-axis concat -> no XLU shifts, no (B, 2e) intermediate).
            mean = jnp.sum(a, axis=0, keepdims=True) * inv_b           # (1, e)
            var = jnp.sum(a * a, axis=0, keepdims=True) * inv_b - mean * mean
            var = jnp.maximum(var, 0.0)                    # guard f32 cancellation

            # Fold BN into one scale + shift over the (B, e) tile.
            s = gamma * lax.rsqrt(var + BN_EPS)            # (1, e)
            t = beta - mean * s                            # (1, e)
            h = a * s + t                                  # f32 elementwise (v5e-safe)

            # Exact-erf GELU (torch.nn.GELU default). tanh-approx would move to the
            # EUP but changes numerics ~1e-3; VALU is not the binding slot here.
            h = 0.5 * h * (1.0 + lax.erf(h * inv_sqrt2))

            # TODO(synk): Dropout applied as identity (eval semantics) — training-mode
            # dropout uses a torch RNG stream that cannot be reproduced bit-exactly.

        b_out = vec_ref[2 * n_hidden:2 * n_hidden + 1, :out_dim]       # (1, out_dim)
        out_ref[...] = (matmul(h, n_hidden) + b_out).astype(out_ref.dtype)

    return kernel


def _pack_params(params, input_dim, embed_dims, out_dim, weight_dtype):
    """Pack torch-style flat params into:
       - ONE (sum(padded_in_dims), max_out) weight buffer (all matmuls, row offsets
         aligned to the dtype's sublane tile so in-kernel static slices are free),
       - ONE (2*n_hidden+1, vec_dim) f32 buffer with gamma/beta rows + final bias.
       Hidden-layer biases are dropped (BN cancels them exactly)."""
    n_hidden = len(embed_dims)
    in_dims = (input_dim,) + tuple(embed_dims)
    out_dims = tuple(embed_dims) + (out_dim,)
    # bf16 packs 2 rows per sublane -> align weight row offsets to 16; f32 -> 8.
    row_pad = 16 if weight_dtype == jnp.bfloat16 else 8
    max_out = max(out_dims)

    # Collect weights / BN vectors from the flat list.
    weights, rows = [], []
    idx = 0
    for e in embed_dims:
        w, _b, gamma, beta = params[idx], params[idx + 1], params[idx + 2], params[idx + 3]
        idx += 4
        weights.append(w)
        vec_dim = max(list(embed_dims) + [out_dim])
        rows.append(jnp.pad(gamma.reshape(1, -1), ((0, 0), (0, vec_dim - e))))
        rows.append(jnp.pad(beta.reshape(1, -1), ((0, 0), (0, vec_dim - e))))
    w_out, b_out = params[idx], params[idx + 1]
    weights.append(w_out)
    vec_dim = max(list(embed_dims) + [out_dim])
    rows.append(jnp.pad(b_out.reshape(1, -1), ((0, 0), (0, vec_dim - out_dim))))
    vecs = jnp.concatenate(rows, axis=0).astype(jnp.float32)   # (2*n_hidden+1, vec_dim)

    # Stack all weights into one buffer at aligned row offsets.
    blocks, row_offsets, off = [], [], 0
    for w, d_in, d_out in zip(weights, in_dims, out_dims):
        rows_padded = ((d_in + row_pad - 1) // row_pad) * row_pad
        blk = jnp.zeros((rows_padded, max_out), jnp.float32)
        blk = blk.at[:d_in, :d_out].set(w.astype(jnp.float32))
        blocks.append(blk)
        row_offsets.append(off)
        off += rows_padded
    wpack = jnp.concatenate(blocks, axis=0).astype(weight_dtype)

    return wpack, vecs, tuple(row_offsets)


def mlp_mu_forward(x, params, use_bf16_weights=True):
    """x: (B, input_dim) f32.  params: torch-style flat list
       [W1,b1,g1,be1, W2,b2,g2,be2, ..., W_out,b_out] with W pre-transposed to
       (in_features, out_features)."""
    n_hidden = (len(params) - 2) // 4
    embed_dims = tuple(params[4 * i].shape[1] for i in range(n_hidden))
    out_dim = params[-2].shape[1]
    input_dim = params[0].shape[0]
    batch = x.shape[0]

    weight_dtype = jnp.bfloat16 if use_bf16_weights else jnp.float32
    wpack, vecs, row_offsets = _pack_params(params, input_dim, embed_dims, out_dim, weight_dtype)
    kernel = _make_mlp_mu_kernel(input_dim, embed_dims, out_dim, batch, row_offsets)

    # Cast x once here (not per-layer in the kernel); MXU is bf16-native everywhere.
    x_in = x.astype(weight_dtype)

    vmem = pl.BlockSpec(memory_space=pltpu.MemorySpace.VMEM)
    return pl.pallas_call(
        kernel,
        out_shape=jax.ShapeDtypeStruct((batch, out_dim), jnp.float32),
        in_specs=[vmem, vmem, vmem],
        out_specs=vmem,
        compiler_params=pltpu.CompilerParams(vmem_limit_bytes=_vmem_limit_bytes()),
    )(x_in, wpack, vecs)


def init_params(key, input_dim, embed_dims, out_dim=9):
    """Deterministic synthetic parameters (same shapes as the torch module)."""
    params = []
    d = input_dim
    for e in embed_dims:
        key, k1, k2 = jax.random.split(key, 3)
        w = jax.random.normal(k1, (d, e), jnp.float32) * (1.0 / math.sqrt(d))
        b = jax.random.normal(k2, (1, e), jnp.float32) * 0.01
        gamma = jnp.ones((1, e), jnp.float32)
        beta = jnp.zeros((1, e), jnp.float32)
        params += [w, b, gamma, beta]
        d = e
    key, k1, k2 = jax.random.split(key, 3)
    w = jax.random.normal(k1, (d, out_dim), jnp.float32) * (1.0 / math.sqrt(d))
    b = jax.random.normal(k2, (1, out_dim), jnp.float32) * 0.01
    params += [w, b]
    return params


def mlp_mu_reference(x, params):
    """Pure-JAX reference with the original torch semantics (hidden biases included,
    two-pass variance, exact-erf GELU) for validation."""
    n_hidden = (len(params) - 2) // 4
    h = x.astype(jnp.float32)
    idx = 0
    for _ in range(n_hidden):
        w, b, gamma, beta = params[idx], params[idx + 1], params[idx + 2], params[idx + 3]
        idx += 4
        h = h @ w + b
        mean = jnp.mean(h, axis=0, keepdims=True)
        var = jnp.mean((h - mean) ** 2, axis=0, keepdims=True)
        h = (h - mean) / jnp.sqrt(var + BN_EPS) * gamma + beta
        h = 0.5 * h * (1.0 + lax.erf(h / math.sqrt(2.0)))
    return h @ params[idx] + params[idx + 1]


if __name__ == "__main__":
    # Small shapes consistent with the module: x is (batch, input_dim).
    batch = 8
    input_dim = 16
    embed_dims = (32, 16)
    dropout = 0.1  # unused at inference (Dropout == identity)

    key = jax.random.PRNGKey(0)
    key, xk = jax.random.split(key)
    x = jax.random.normal(xk, (batch, input_dim), jnp.float32)

    params = init_params(key, input_dim, embed_dims, out_dim=9)
    ref = mlp_mu_reference(x, params)

    # Default path (bf16 weights, MXU-native on all generations): tolerance bounded
    # by weight/input rounding; accumulation stays f32.
    out = jax.block_until_ready(mlp_mu_forward(x, params))
    assert out.shape == (batch, 9), out.shape
    err_bf16 = float(jnp.max(jnp.abs(out - ref)))
    assert jnp.allclose(out, ref, atol=5e-2, rtol=5e-2), f"bf16 max abs err = {err_bf16}"

    # f32 path: tight parity with the torch-semantics reference (bias removal,
    # folded BN and two-reduction stats are mathematically exact transforms).
    out_f32 = jax.block_until_ready(mlp_mu_forward(x, params, use_bf16_weights=False))
    err_f32 = float(jnp.max(jnp.abs(out_f32 - ref)))
    assert jnp.allclose(out_f32, ref, atol=1e-4, rtol=1e-4), f"f32 max abs err = {err_f32}"

    print("KERNEL_OK")
</pallas_src>

<mosaic_0001>
module attributes {stable_mosaic.version = 11 : i64} {
  func.func @kernel(%arg0: memref<8x16xbf16, #tpu.memory_space<vmem>>, %arg1: memref<64x32xbf16, #tpu.memory_space<vmem>>, %arg2: memref<5x32xf32, #tpu.memory_space<vmem>>, %arg3: memref<8x9xf32, #tpu.memory_space<vmem>>) attributes {dimension_semantics = [], scalar_prefetch = 0 : i64, scratch_operands = 0 : i64, tpu.core_type = #tpu.core_type<tc>} {
    %c0 = arith.constant 0 : index
    %c0_0 = arith.constant 0 : index
    %0 = vector.load %arg0[%c0, %c0_0] : memref<8x16xbf16, #tpu.memory_space<vmem>>, vector<8x16xbf16>
    %c0_1 = arith.constant 0 : index
    %c0_2 = arith.constant 0 : index
    %1 = vector.load %arg1[%c0_1, %c0_2] : memref<64x32xbf16, #tpu.memory_space<vmem>>, vector<16x32xbf16>
    %cst = arith.constant dense<0.000000e+00> : vector<8x32xf32>
    %2 = tpu.matmul %0, %1, %cst {dimension_numbers = #tpu.dot_dimension_numbers<[1], [0], [0], [1], [0, 0, 1, 1], [], []>} : vector<8x16xbf16>, vector<16x32xbf16>, vector<8x32xf32> -> vector<8x32xf32>
    %c0_3 = arith.constant 0 : index
    %c0_4 = arith.constant 0 : index
    %3 = vector.load %arg2[%c0_3, %c0_4] : memref<5x32xf32, #tpu.memory_space<vmem>>, vector<1x32xf32>
    %c1 = arith.constant 1 : index
    %c0_5 = arith.constant 0 : index
    %4 = vector.load %arg2[%c1, %c0_5] : memref<5x32xf32, #tpu.memory_space<vmem>>, vector<1x32xf32>
    %cst_6 = arith.constant dense<0.000000e+00> : vector<32xf32>
    %5 = vector.multi_reduction <add>, %2, %cst_6 [0] : vector<8x32xf32> to vector<32xf32>
    %6 = vector.shape_cast %5 : vector<32xf32> to vector<1x32xf32>
    %cst_7 = arith.constant 1.250000e-01 : f32
    %7 = vector.broadcast %cst_7 : f32 to vector<1x32xf32>
    %8 = arith.mulf %6, %7 : vector<1x32xf32>
    %9 = arith.mulf %2, %2 : vector<8x32xf32>
    %cst_8 = arith.constant dense<0.000000e+00> : vector<32xf32>
    %10 = vector.multi_reduction <add>, %9, %cst_8 [0] : vector<8x32xf32> to vector<32xf32>
    %11 = vector.shape_cast %10 : vector<32xf32> to vector<1x32xf32>
    %cst_9 = arith.constant 1.250000e-01 : f32
    %12 = vector.broadcast %cst_9 : f32 to vector<1x32xf32>
    %13 = arith.mulf %11, %12 : vector<1x32xf32>
    %14 = arith.mulf %8, %8 : vector<1x32xf32>
    %15 = arith.subf %13, %14 : vector<1x32xf32>
    %cst_10 = arith.constant 0.000000e+00 : f32
    %16 = vector.broadcast %cst_10 : f32 to vector<1x32xf32>
    %17 = arith.maximumf %15, %16 : vector<1x32xf32>
    %cst_11 = arith.constant 9.99999974E-6 : f32
    %18 = vector.broadcast %cst_11 : f32 to vector<1x32xf32>
    %19 = arith.addf %17, %18 : vector<1x32xf32>
    %20 = math.rsqrt %19 : vector<1x32xf32>
    %21 = arith.mulf %3, %20 : vector<1x32xf32>
    %22 = arith.mulf %8, %21 : vector<1x32xf32>
    %23 = arith.subf %4, %22 : vector<1x32xf32>
    %24 = vector.broadcast %21 : vector<1x32xf32> to vector<8x32xf32>
    %25 = arith.mulf %2, %24 : vector<8x32xf32>
    %26 = vector.broadcast %23 : vector<1x32xf32> to vector<8x32xf32>
    %27 = arith.addf %25, %26 : vector<8x32xf32>
    %cst_12 = arith.constant 5.000000e-01 : f32
    %28 = vector.broadcast %cst_12 : f32 to vector<8x32xf32>
    %29 = arith.mulf %28, %27 : vector<8x32xf32>
    %cst_13 = arith.constant 0.707106769 : f32
    %30 = vector.broadcast %cst_13 : f32 to vector<8x32xf32>
    %31 = arith.mulf %27, %30 : vector<8x32xf32>
    %32 = math.erf %31 : vector<8x32xf32>
    %cst_14 = arith.constant 1.000000e+00 : f32
    %33 = vector.broadcast %cst_14 : f32 to vector<8x32xf32>
    %34 = arith.addf %33, %32 : vector<8x32xf32>
    %35 = arith.mulf %29, %34 : vector<8x32xf32>
    %c16 = arith.constant 16 : index
    %c0_15 = arith.constant 0 : index
    %36 = vector.load %arg1[%c16, %c0_15] : memref<64x32xbf16, #tpu.memory_space<vmem>>, vector<32x16xbf16>
    %37 = arith.truncf %35 : vector<8x32xf32> to vector<8x32xbf16>
    %cst_16 = arith.constant dense<0.000000e+00> : vector<8x16xf32>
    %38 = tpu.matmul %37, %36, %cst_16 {dimension_numbers = #tpu.dot_dimension_numbers<[1], [0], [0], [1], [0, 0, 1, 1], [], []>} : vector<8x32xbf16>, vector<32x16xbf16>, vector<8x16xf32> -> vector<8x16xf32>
    %c2 = arith.constant 2 : index
    %c0_17 = arith.constant 0 : index
    %39 = vector.load %arg2[%c2, %c0_17] : memref<5x32xf32, #tpu.memory_space<vmem>>, vector<1x16xf32>
    %c3 = arith.constant 3 : index
    %c0_18 = arith.constant 0 : index
    %40 = vector.load %arg2[%c3, %c0_18] : memref<5x32xf32, #tpu.memory_space<vmem>>, vector<1x16xf32>
    %cst_19 = arith.constant dense<0.000000e+00> : vector<16xf32>
    %41 = vector.multi_reduction <add>, %38, %cst_19 [0] : vector<8x16xf32> to vector<16xf32>
    %42 = vector.shape_cast %41 : vector<16xf32> to vector<1x16xf32>
    %cst_20 = arith.constant 1.250000e-01 : f32
    %43 = vector.broadcast %cst_20 : f32 to vector<1x16xf32>
    %44 = arith.mulf %42, %43 : vector<1x16xf32>
    %45 = arith.mulf %38, %38 : vector<8x16xf32>
    %cst_21 = arith.constant dense<0.000000e+00> : vector<16xf32>
    %46 = vector.multi_reduction <add>, %45, %cst_21 [0] : vector<8x16xf32> to vector<16xf32>
    %47 = vector.shape_cast %46 : vector<16xf32> to vector<1x16xf32>
    %cst_22 = arith.constant 1.250000e-01 : f32
    %48 = vector.broadcast %cst_22 : f32 to vector<1x16xf32>
    %49 = arith.mulf %47, %48 : vector<1x16xf32>
    %50 = arith.mulf %44, %44 : vector<1x16xf32>
    %51 = arith.subf %49, %50 : vector<1x16xf32>
    %cst_23 = arith.constant 0.000000e+00 : f32
    %52 = vector.broadcast %cst_23 : f32 to vector<1x16xf32>
    %53 = arith.maximumf %51, %52 : vector<1x16xf32>
    %cst_24 = arith.constant 9.99999974E-6 : f32
    %54 = vector.broadcast %cst_24 : f32 to vector<1x16xf32>
    %55 = arith.addf %53, %54 : vector<1x16xf32>
    %56 = math.rsqrt %55 : vector<1x16xf32>
    %57 = arith.mulf %39, %56 : vector<1x16xf32>
    %58 = arith.mulf %44, %57 : vector<1x16xf32>
    %59 = arith.subf %40, %58 : vector<1x16xf32>
    %60 = vector.broadcast %57 : vector<1x16xf32> to vector<8x16xf32>
    %61 = arith.mulf %38, %60 : vector<8x16xf32>
    %62 = vector.broadcast %59 : vector<1x16xf32> to vector<8x16xf32>
    %63 = arith.addf %61, %62 : vector<8x16xf32>
    %cst_25 = arith.constant 5.000000e-01 : f32
    %64 = vector.broadcast %cst_25 : f32 to vector<8x16xf32>
    %65 = arith.mulf %64, %63 : vector<8x16xf32>
    %cst_26 = arith.constant 0.707106769 : f32
    %66 = vector.broadcast %cst_26 : f32 to vector<8x16xf32>
    %67 = arith.mulf %63, %66 : vector<8x16xf32>
    %68 = math.erf %67 : vector<8x16xf32>
    %cst_27 = arith.constant 1.000000e+00 : f32
    %69 = vector.broadcast %cst_27 : f32 to vector<8x16xf32>
    %70 = arith.addf %69, %68 : vector<8x16xf32>
    %71 = arith.mulf %65, %70 : vector<8x16xf32>
    %c4 = arith.constant 4 : index
    %c0_28 = arith.constant 0 : index
    %72 = vector.load %arg2[%c4, %c0_28] : memref<5x32xf32, #tpu.memory_space<vmem>>, vector<1x9xf32>
    %c48 = arith.constant 48 : index
    %c0_29 = arith.constant 0 : index
    %73 = vector.load %arg1[%c48, %c0_29] : memref<64x32xbf16, #tpu.memory_space<vmem>>, vector<16x9xbf16>
    %74 = arith.truncf %71 : vector<8x16xf32> to vector<8x16xbf16>
    %cst_30 = arith.constant dense<0.000000e+00> : vector<8x9xf32>
    %75 = tpu.matmul %74, %73, %cst_30 {dimension_numbers = #tpu.dot_dimension_numbers<[1], [0], [0], [1], [0, 0, 1, 1], [], []>} : vector<8x16xbf16>, vector<16x9xbf16>, vector<8x9xf32> -> vector<8x9xf32>
    %76 = vector.broadcast %72 : vector<1x9xf32> to vector<8x9xf32>
    %77 = arith.addf %75, %76 : vector<8x9xf32>
    %c0_31 = arith.constant 0 : index
    %c0_32 = arith.constant 0 : index
    %78 = vector.load %arg3[%c0_31, %c0_32] : memref<8x9xf32, #tpu.memory_space<vmem>>, vector<8x9xf32>
    tpu.vector_store %arg3[%c0_31, %c0_32], %77 {strides = array<i32>} : memref<8x9xf32, #tpu.memory_space<vmem>>, vector<8x9xf32>,
    return
  }
}

</mosaic_0001>

<bundles_post_ra>
// kernel: tpu_custom_call.1
= control target key start
LH: loop header
LB: loop body
LE: loop exit
PB: predicated region body
PF: predicated region fallthrough
CT: control target
= control target key end

     0   :  { %8 = vsyncpa [#allocation3], 0  ;;  %s558_s0 = inlined_call_operand.hbm [shape: bf16[8,16], index: 0, kind: input, shape index: {}]   ;;  %s559_s1 = inlined_call_operand.hbm [shape: bf16[64,32], index: 1, kind: input, shape index: {}]   ;;  %s560_s2 = inlined_call_operand.hbm [shape: f32[5,32], index: 2, kind: input, shape index: {}]   ;;  %s561_s3 = inlined_call_operand.hbm [shape: f32[8,9], index: 3, kind: output, shape index: {}]  }
   0x1   :  { %9 = vsyncpa [#allocation6], 0 }
   0x2   :  { %10 = vsyncpa [#allocation4], 0  ;;  %s475_s12 = smov [#allocation5]   ;;  %s381_s16 = scalar_lea.hbm %s559_s1, 512 }
   0x3   :  { %s26_s13 = sshll.u32 %s475_s12, 4  ;;  %p382_p0 = scmp.ne.s32.totalorder %s559_s1, %s381_s16  ;;  %s27_s13 = int_to_ptr.vmem [resolvable:$true] %s26_s13 }
   0x4   :  { %p385_p1 = scmp.lt.u32.totalorder %s381_s16, %s559_s1 }
   0x6   :  { %p387_p2 = pnand %p385_p1, %p382_p0 }
   0x8   :  { %390 = shalt.err (!%p387_p2)
}
   0x9   :  { %s391_s21 = scalar_lea.vmem %s27_s13, 512  ;;  %p396_p4 = scmp.lt.s32.totalorder %s27_s13, %s27_s13 }
   0xa   :  { %p392_p3 = scmp.ne.s32.totalorder %s27_s13, %s391_s21  ;;  %p397_p5 = scmp.lt.s32.totalorder %s391_s21, %s391_s21 }
   0xc   :  { %p398_p6 = por %p397_p5, %p396_p4 }
   0xe   :  { %p399_p7 = pnand %p398_p6, %p392_p3 }
  0x10   :  { %402 = shalt.err (!%p399_p7)
}
  0x11   :  { %s476_s22 = smov 64   ;;  %s477_s23 = smov 4  }
  0x12   :  { %32 = dma.hbm_to_vmem [thread:$0]  %s559_s1, 512, %s27_s13, [#allocation6], %s476_s22, %s476_s22, %s477_s23  }
  0x13   :  { %s478_s26 = smov [#allocation2]   ;;  %s479_s28 = smov [#allocation7]  }
  0x14   :  { %s17_s27 = sshll.u32 %s478_s26, 4  ;;  %s39_s29 = sshll.u32 %s479_s28, 4  ;;  %s18_s27 = int_to_ptr.vmem [resolvable:$true] %s17_s27  ;;  %s40_s29 = int_to_ptr.vmem [resolvable:$true] %s39_s29 }
  0x15   :  { %s403_s5 = scalar_lea.hbm %s558_s0, 64 }
  0x16   :  { %p404_p8 = scmp.ne.s32.totalorder %s558_s0, %s403_s5  ;;  %p407_p9 = scmp.lt.u32.totalorder %s403_s5, %s558_s0 }
  0x18   :  { %p409_p10 = pnand %p407_p9, %p404_p8 }
  0x1a   :  { %412 = shalt.err (!%p409_p10)
}
  0x1b   :  { %s413_s1 = scalar_lea.vmem %s18_s27, 64  ;;  %p418_p12 = scmp.lt.s32.totalorder %s18_s27, %s18_s27 }
  0x1c   :  { %p414_p11 = scmp.ne.s32.totalorder %s18_s27, %s413_s1  ;;  %p419_p13 = scmp.lt.s32.totalorder %s413_s1, %s413_s1 }
  0x1e   :  { %p420_p0 = por %p419_p13, %p418_p12 }
  0x20   :  { %p421_p1 = pnand %p420_p0, %p414_p11 }
  0x22   :  { %424 = shalt.err (!%p421_p1)
}
  0x23   :  { %20 = dma.hbm_to_vmem [thread:$0]  %s558_s0, 64, %s18_s27, [#allocation3]  }
  0x24   :  { %s425_s14 = scalar_lea.hbm %s560_s2, 128 }
  0x25   :  { %p426_p2 = scmp.ne.s32.totalorder %s560_s2, %s425_s14  ;;  %p429_p3 = scmp.lt.u32.totalorder %s425_s14, %s560_s2 }
  0x27   :  { %p431_p4 = pnand %p429_p3, %p426_p2 }
  0x29   :  { %434 = shalt.err (!%p431_p4)
}
  0x2a   :  { %s435_s19 = scalar_lea.vmem %s40_s29, 128  ;;  %p440_p6 = scmp.lt.s32.totalorder %s40_s29, %s40_s29 }
  0x2b   :  { %p436_p5 = scmp.ne.s32.totalorder %s40_s29, %s435_s19  ;;  %p441_p7 = scmp.lt.s32.totalorder %s435_s19, %s435_s19 }
  0x2d   :  { %p442_p8 = por %p441_p7, %p440_p6 }
  0x2f   :  { %p443_p9 = pnand %p442_p8, %p436_p5 }
  0x31   :  { %446 = shalt.err (!%p443_p9)
}
  0x32   :  { %42 = dma.hbm_to_vmem [thread:$0]  %s560_s2, 128, %s40_s29, [#allocation6]  }
  0x33   :  { %469 = dma.done.wait [#allocation3], 64  }
  0x34   :  { %470 = vsyncadd [#allocation3], 4294967232 }
  0x35   :  { %471 = dma.done.wait [#allocation6], 640  }
  0x36   :  { %472 = vsyncadd [#allocation6], 4294966656  ;;  %v480_v0 = vmov 0.0   ;;  %vm481_vm0 = vmmov 0   ;;  %v369_v1 = vld [vmem:[#allocation5] sm:$0xff]   ;;  %vm62_vm1 = vcmask 130048   ;;  %v134_v30 = vlaneseq }
  0x37   :  { %341 = vmatprep.subr.bf16.mxu0 %v480_v0  ;;  %343 = vmatprep.mubr.msk.bf16.mxu0 %vm481_vm0, %v480_v0  ;;  %v53_v2 = vld [vmem:[#allocation2] sm:$0xf]  ;;  %v370_v3 = vld [vmem:[#allocation5 + $0x8] sm:$0xff]   ;;  %v371_v4 = vld [vmem:[#allocation5 + $0x10] sm:$0xff]   ;;  %vm108_vm2 = vcmask 261120   ;;  %s482_s2 = smov [#allocation8]  }
  0x38   :  { %347 = vmatprep.subr.bf16.mxu1 %v480_v0  ;;  %351 = vmatprep.mubr.msk.bf16.mxu1 %vm481_vm0, %v480_v0  ;;  %v135_v31 = vshrl.u32 %v134_v30, 7  ;;  %v106_v32 = vld [vmem:[#allocation7] sm:$0x1]  ;;  %v107_v36 = vld [vmem:[#allocation7 + $0x1] sm:$0x1]  ;;  %v372_v49 = vld [vmem:[#allocation5 + $0x18] sm:$0xff]  }
  0x39   :  { %342 = vmatpush3.bf16.msra.mxu0 %v369_v1  ;;  %348 = vmatpush3.bf16.msra.mxu1 %v370_v3  ;;  %s316_s21 = sshll.u32 %s482_s2, 4  ;;  %vm308_vm3 = vcmask 72704   ;;  %s317_s21 = int_to_ptr.vmem [resolvable:$true] %s316_s21 }
  0x3a   :  { %355 = vmatprep.subr.bf16.mxu0 %v480_v0  ;;  %349 = vmatprep.subr.bf16.mxu1 %v480_v0  ;;  %v136_v33 = vsub.s32 0, %v135_v31  ;;  %s447_s22 = scalar_lea.vmem %s317_s21, 128  ;;  %p452_p11 = scmp.lt.s32.totalorder %s317_s21, %s317_s21 }
  0x3b   :  { %p448_p10 = scmp.ne.s32.totalorder %s317_s21, %s447_s22  ;;  %p453_p12 = scmp.lt.s32.totalorder %s447_s22, %s447_s22 }
  0x3c   :  { %344 = vmatmul.mubr.msk.bf16.vlgmr.msra.gmra.mrb[0].mxu0 %vm62_vm1, %v53_v2 }
  0x3d   :  { %357 = vmatprep.mubr.msk.bf16.mxu0 %vm481_vm0, %v480_v0  ;;  %350 = vmatpush3.bf16.msra.mxu1 %v371_v4  ;;  %p454_p13 = por %p453_p12, %p452_p11 }
  0x3e   :  { %356 = vmatpush3.bf16.msra.mxu0 %v372_v49 }
  0x3f   :  { %p455_p0 = pnand %p454_p13, %p448_p10 }
 0x10f   :  { %v100_v5 = vpop.f32.mrb[0].mxu0 }
 0x110   :  { %v109_v6 = vsel %vm108_vm2, %v100_v5, 0.0  ;;  %v117_v7 = vmul.f32 %v100_v5, %v100_v5  ;;  %v345_v8 = vpop.f32.mrb[1].mxu0 }
 0x111   :  { %v110_v9 = vrot.slane %v109_v6, 4  ;;  %v103_v10 = vpop.f32.mrb[2].mxu0 }
 0x112   :  { %v118_v11 = vsel %vm108_vm2, %v117_v7, 0.0  ;;  %v346_v12 = vpop.f32.mrb[3].mxu0 }
 0x113   :  { %v111_v13 = vadd.f32 %v110_v9, %v109_v6  ;;  %v119_v14 = vrot.slane %v118_v11, 4 }
 0x115   :  { %v112_v15 = vrot.slane %v111_v13, 2  ;;  %v120_v16 = vadd.f32 %v119_v14, %v118_v11  ;;  %v209_v11 = vld [vmem:[#allocation7 + $0x2] sm:$0x1]  ;;  %v210_v14 = vld [vmem:[#allocation7 + $0x3] sm:$0x1] }
 0x117   :  { %v113_v17 = vadd.f32 %v112_v15, %v111_v13  ;;  %v121_v18 = vrot.slane %v120_v16, 2 }
 0x119   :  { %v114_v19 = vrot.slane %v113_v17, 1  ;;  %v122_v20 = vadd.f32 %v121_v18, %v120_v16 }
 0x11b   :  { %v115_v21 = vadd.f32 %v114_v19, %v113_v17  ;;  %v123_v22 = vrot.slane %v122_v20, 1 }
 0x11d   :  { %v116_v23 = vmul.f32 0.125, %v115_v21  ;;  %v124_v24 = vadd.f32 %v123_v22, %v122_v20 }
 0x11f   :  { %v125_v25 = vmul.f32 0.125, %v124_v24  ;;  %v126_v26 = vmul.f32 %v116_v23, %v116_v23 }
 0x121   :  { %v127_v27 = vsub.f32 %v125_v25, %v126_v26 }
 0x123   :  { %v128_v28 = vmax.f32 %v127_v27, 0.0  ;;  %v331_v27 = vld [vmem:[#allocation7 + $0x4] ss:$0 sm:$0xff] }
 0x125   :  { %v129_v29 = vadd.f32 1e-05, %v128_v28 }
 0x127   :  { %373 = vrsqrt.f32 %v129_v29 }
 0x131   :  { %v374_v34 = vpop.eup %373 }
 0x132   :  { %v131_v35 = vmul.f32 %v374_v34, %v106_v32 }
 0x134   :  { %v132_v37 = vmul.f32 %v131_v35, %v116_v23  ;;  %v137_v38 = vrot.slane %v131_v35, %v136_v33 }
 0x136   :  { %v133_v39 = vsub.f32 %v107_v36, %v132_v37  ;;  %v138_v40 = vmul.f32 %v137_v38, %v100_v5 }
 0x138   :  { %v142_v41 = vrot.slane %v133_v39, %v136_v33 }
 0x13a   :  { %v143_v42 = vadd.f32 %v142_v41, %v138_v40 }
 0x13c   :  { %v145_v43 = vmul.f32 0.70710677, %v143_v42  ;;  %v144_v45 = vmul.f32 0.5, %v143_v42 }
 0x13e   :  { %375 = verf.f32 %v145_v43 }
 0x148   :  { %v376_v44 = vpop.eup %375 }
 0x149   :  { %v147_v46 = vadd.f32 1.0, %v376_v44 }
 0x14b   :  { %v148_v47 = vmul.f32 %v147_v46, %v144_v45 }
 0x14d   :  { %v153_v48 = vpack.c.bf16 %v148_v47, %v148_v47 }
 0x14f   :  { %352 = vmatmul.mubr.msk.bf16.vlgmr.msra.gmra.mrb[0].mxu1 %vm108_vm2, %v153_v48 }
 0x222   :  { %v203_v50 = vpop.f32.mrb[0].mxu1 }
 0x223   :  { %v211_v51 = vsel %vm62_vm1, %v203_v50, 0.0  ;;  %v219_v52 = vmul.f32 %v203_v50, %v203_v50  ;;  %v353_v53 = vpop.f32.mrb[1].mxu1 }
 0x224   :  { %v212_v54 = vrot.slane %v211_v51, 4  ;;  %v206_v55 = vpop.f32.mrb[2].mxu1 }
 0x225   :  { %v220_v56 = vsel %vm62_vm1, %v219_v52, 0.0  ;;  %v354_v57 = vpop.f32.mrb[3].mxu1 }
 0x226   :  { %v213_v58 = vadd.f32 %v212_v54, %v211_v51  ;;  %v221_v59 = vrot.slane %v220_v56, 4 }
 0x228   :  { %v214_v60 = vrot.slane %v213_v58, 2  ;;  %v222_v61 = vadd.f32 %v221_v59, %v220_v56 }
 0x22a   :  { %v215_v62 = vadd.f32 %v214_v60, %v213_v58  ;;  %v223_v63 = vrot.slane %v222_v61, 2 }
 0x22c   :  { %v216_v0 = vrot.slane %v215_v62, 1  ;;  %v224_v1 = vadd.f32 %v223_v63, %v222_v61 }
 0x22e   :  { %v217_v2 = vadd.f32 %v216_v0, %v215_v62  ;;  %v225_v3 = vrot.slane %v224_v1, 1 }
 0x230   :  { %v218_v4 = vmul.f32 0.125, %v217_v2  ;;  %v226_v5 = vadd.f32 %v225_v3, %v224_v1 }
 0x232   :  { %v227_v6 = vmul.f32 0.125, %v226_v5  ;;  %v228_v7 = vmul.f32 %v218_v4, %v218_v4 }
 0x234   :  { %v229_v8 = vsub.f32 %v227_v6, %v228_v7 }
 0x236   :  { %v230_v9 = vmax.f32 %v229_v8, 0.0 }
 0x238   :  { %v231_v10 = vadd.f32 1e-05, %v230_v9 }
 0x23a   :  { %377 = vrsqrt.f32 %v231_v10 }
 0x244   :  { %v378_v12 = vpop.eup %377 }
 0x245   :  { %v233_v13 = vmul.f32 %v378_v12, %v209_v11 }
 0x247   :  { %v234_v15 = vmul.f32 %v233_v13, %v218_v4  ;;  %v239_v16 = vrot.slane %v233_v13, %v136_v33 }
 0x249   :  { %v235_v17 = vsub.f32 %v210_v14, %v234_v15  ;;  %v240_v18 = vmul.f32 %v239_v16, %v203_v50 }
 0x24b   :  { %v244_v19 = vrot.slane %v235_v17, %v136_v33 }
 0x24d   :  { %v245_v20 = vadd.f32 %v244_v19, %v240_v18 }
 0x24f   :  { %v247_v21 = vmul.f32 0.70710677, %v245_v20  ;;  %v246_v23 = vmul.f32 0.5, %v245_v20 }
 0x251   :  { %379 = verf.f32 %v247_v21 }
 0x25b   :  { %v380_v22 = vpop.eup %379 }
 0x25c   :  { %v249_v24 = vadd.f32 1.0, %v380_v22 }
 0x25e   :  { %v250_v25 = vmul.f32 %v249_v24, %v246_v23 }
 0x260   :  { %v254_v26 = vpack.c.bf16 %v250_v25, %v250_v25 }
 0x262   :  { %358 = vmatmul.mubr.msk.bf16.vlgmr.msra.gmra.mrb[4].mxu0 %vm62_vm1, %v254_v26 }
 0x335   :  { %v302_v28 = vpop.f32.mrb[4].mxu0 }
 0x336   :  { %v303_v29 = vadd.f32 %v331_v27, %v302_v28  ;;  %v359_v30 = vpop.f32.mrb[5].mxu0 }
 0x337   :  { %v305_v31 = vpop.f32.mrb[6].mxu0 }
 0x338   :  { %v360_v32 = vpop.f32.mrb[7].mxu0  ;;  %309 = vst.msk [vmem:[#allocation8] sm:$0xff] %vm308_vm3, %v303_v29 }
 0x339   :  { %458 = shalt.err (!%p455_p0)
}
 0x33a   :  { %s459_s25 = scalar_lea.hbm %s561_s3, 128 }
 0x33b   :  { %p460_p1 = scmp.ne.s32.totalorder %s561_s3, %s459_s25  ;;  %p463_p2 = scmp.lt.u32.totalorder %s459_s25, %s561_s3 }
 0x33d   :  { %p465_p3 = pnand %p463_p2, %p460_p1 }
 0x33f   :  { %468 = shalt.err (!%p465_p3)
}
 0x340   :  { %319 = dma.vmem_to_hbm [thread:$0]  %s317_s21, 128, %s561_s3, [#allocation4]  }
 0x341   :  { %473 = dma.done.wait [#allocation4], 128  }
 0x342   :  { %474 = vsyncadd [#allocation4], 4294967168 }
 0x343   :  { %323 = vsyncpa [#allocation3], 1 }
 0x344   :  { %324 = vsyncpa [#allocation6], 1 }
 0x345   :  { %325 = vsyncpa [#allocation4], 1 }

</bundles_post_ra>
